<compile_context>
chip_gen: v5e
topology: v5e:2x2
jax: 0.10.0
libtpu: 0.0.40
codegen_flags: <defaults>
</compile_context>

<pallas_src>
import jax
import jax.numpy as jnp
from jax.experimental import pallas as pl
from jax.experimental.pallas import tpu as pltpu


def _round_up(x, m):
    return ((x + m - 1) // m) * m


def _make_sepconv_kernel(Cin, Cout, PACK, KH, KW, Wp, TM, n_chunks, stride, dilation):
    taps = [(kh, kw) for kh in range(KH) for kw in range(KW)]
    Cin_pk = PACK * Cin
    hoist = n_chunks > 1  # reuse the lane-broadcast weight tiles across chunks

    def kernel(x_ref, wdw_ref, wpw_ref, o_ref):
        # x_ref  : (PACK*Cin, L)        zero-padded, row-flattened packed images
        # wdw_ref: (PACK*Cin, KH*KW)    depthwise taps (tiled per packed image)
        # wpw_ref: (Cout, Cin)          transposed pointwise (1x1) weights
        # o_ref  : (PACK*Cout, M_pad)   flattened "wide" (Ho, Wp) outputs, lane-dense
        wdw = wdw_ref[...].astype(jnp.float32)   # loaded/cast once
        wpw = wpw_ref[...].astype(jnp.float32)   # (Cout, Cin)

        if hoist:
            # Hoisted broadcasts: taps + Cin lane-broadcasts total instead of
            # (taps + Cin) * n_chunks (JAX does not CSE broadcast_in_dim).
            wdw_col = [jnp.broadcast_to(wdw[:, t:t + 1], (Cin_pk, TM))
                       for t in range(len(taps))]
            wpw_col = [jnp.broadcast_to(wpw[:, ci:ci + 1], (Cout, TM))
                       for ci in range(Cin)]
        else:
            # Single chunk: implicit broadcast at the (single) use site is the same
            # op count and keeps vreg liveness minimal.
            wdw_col = [wdw[:, t:t + 1] for t in range(len(taps))]
            wpw_col = [wpw[:, ci:ci + 1] for ci in range(Cin)]

        def tap_slice(m0, kh, kw):
            off = kh * dilation * Wp + kw * dilation
            start = stride * m0 + off            # Python int -> static VMEM slice
            if stride == 1:
                return x_ref[:, start:start + TM]                 # (Cin_pk, TM)
            return x_ref[:, pl.ds(start, TM, stride=stride)]      # strided ref read

        # Static chunk loop: all slice starts are Python ints, so every load/store
        # lowers to a static-offset VMEM access (no dynamic lane indexing).
        for mi in range(n_chunks):
            m0 = mi * TM

            # Depthwise KxK: init from tap 0, accumulate the rest.
            kh0, kw0 = taps[0]
            acc = tap_slice(m0, kh0, kw0).astype(jnp.float32) * wdw_col[0]
            for t, (kh, kw) in enumerate(taps[1:], start=1):
                acc = acc + tap_slice(m0, kh, kw).astype(jnp.float32) * wdw_col[t]

            # Pointwise 1x1 per packed image: Cin rank-1 broadcast-FMAs on the VPU.
            for p in range(PACK):
                r = p * Cin
                out_p = wpw_col[0] * acc[r:r + 1, :]
                for ci in range(1, Cin):
                    out_p = out_p + wpw_col[ci] * acc[r + ci:r + ci + 1, :]
                # 128-aligned, lane-dense store
                o_ref[p * Cout:(p + 1) * Cout, m0:m0 + TM] = out_p.astype(o_ref.dtype)

    return kernel


def separable_conv2d(x_nchw, w_dw, w_pw, *, stride=1, padding=0, dilation=1):
    """Matches SeparableConv2d.forward (bias=False).

    x_nchw : (B, Cin, H, W)
    w_dw   : (Cin, 1, KH, KW)   -- nn.Conv2d(groups=Cin) weight layout
    w_pw   : (Cout, Cin, 1, 1)  -- nn.Conv2d(1x1) weight layout
    returns: (B, Cout, Ho, Wo)
    """
    B, Cin, H, W = x_nchw.shape
    KH, KW = int(w_dw.shape[2]), int(w_dw.shape[3])
    Cout = int(w_pw.shape[0])
    Ho = (H + 2 * padding - dilation * (KH - 1) - 1) // stride + 1
    Wo = (W + 2 * padding - dilation * (KW - 1) - 1) // stride + 1
    Hp, Wp = H + 2 * padding, W + 2 * padding

    # Batch-pair packing: fill the 8 f32 sublanes with channels of PACK images.
    PACK = max(1, min(B, 8 // Cin)) if Cin <= 8 else 1
    PACK = min(PACK, 2)
    Bp = _round_up(B, PACK)
    B2 = Bp // PACK
    Cin_pk = PACK * Cin

    # ---- plain-JAX glue: zero-pad (batch + spatial) and row-flatten ----
    x_pad = jnp.pad(x_nchw, ((0, Bp - B), (0, 0),
                             (padding, padding), (padding, padding)))
    x_flat = x_pad.reshape(Bp, Cin, Hp * Wp)

    # "Wide" output rows: Wp columns per output row; the trailing (KW-1)*dilation
    # columns per row are garbage and are cropped after the kernel.
    M_full = Ho * Wp
    M128 = _round_up(M_full, 128)
    TM = M128 if M128 <= 512 else 256            # single chunk when it fits, else 256
    n_chunks = pl.cdiv(M_full, TM)
    M_pad = n_chunks * TM

    max_off = (KH - 1) * dilation * Wp + (KW - 1) * dilation
    L = max(Hp * Wp, stride * (M_pad - 1) + max_off + 1)
    L = _round_up(L, 128)
    x_flat = jnp.pad(x_flat, ((0, 0), (0, 0), (0, L - Hp * Wp)))
    x_pk = x_flat.reshape(B2, Cin_pk, L)         # channels of PACK images on sublanes

    wdw = w_dw[:, 0, :, :].reshape(Cin, KH * KW)     # tap t = kh*KW + kw
    wdw_pk = jnp.tile(wdw, (PACK, 1))                # (PACK*Cin, KH*KW)
    wpw_t = w_pw[:, :, 0, 0]                         # (Cout, Cin)

    kernel = _make_sepconv_kernel(Cin, Cout, PACK, KH, KW, Wp, TM, n_chunks,
                                  stride, dilation)

    itemsize = jnp.dtype(x_nchw.dtype).itemsize
    vmem_bytes = (2 * Cin_pk * L * itemsize                  # double-buffered input
                  + 2 * PACK * Cout * M_pad * itemsize       # double-buffered output
                  + 4 * (Cin_pk * KH * KW + Cout * Cin) * 2  # weight blocks
                  + (4 << 20))                               # compiler scratch headroom
    vmem_bytes = int(min(max(vmem_bytes, 16 << 20), 48 << 20))  # v7x-safe clamp

    out_flat = pl.pallas_call(
        kernel,
        out_shape=jax.ShapeDtypeStruct((B2, PACK * Cout, M_pad), x_nchw.dtype),
        grid=(B2,),
        in_specs=[
            pl.BlockSpec((None, Cin_pk, L), lambda b: (b, 0, 0)),
            pl.BlockSpec((Cin_pk, KH * KW), lambda b: (0, 0)),
            pl.BlockSpec((Cout, Cin), lambda b: (0, 0)),
        ],
        out_specs=pl.BlockSpec((None, PACK * Cout, M_pad), lambda b: (b, 0, 0)),
        compiler_params=pltpu.CompilerParams(
            dimension_semantics=("parallel",),
            vmem_limit_bytes=vmem_bytes,
        ),
    )(x_pk, wdw_pk, wpw_t)

    # Unpack batch pairs, crop the wide rows back to (Ho, Wo); output is NCHW.
    out = out_flat.reshape(B2, PACK, Cout, M_pad).reshape(Bp, Cout, M_pad)[:B]
    out = out[:, :, :M_full].reshape(B, Cout, Ho, Wp)[:, :, :, :Wo]
    return out


def _reference(x_nchw, w_dw, w_pw, *, stride=1, padding=0, dilation=1):
    """Pure-JAX reference (lax.conv_general_dilated) for validation."""
    Cin = x_nchw.shape[1]
    dw = jax.lax.conv_general_dilated(
        x_nchw, w_dw,
        window_strides=(stride, stride),
        padding=((padding, padding), (padding, padding)),
        rhs_dilation=(dilation, dilation),
        dimension_numbers=("NCHW", "OIHW", "NCHW"),
        feature_group_count=Cin,
    )
    return jax.lax.conv_general_dilated(
        dw, w_pw,
        window_strides=(1, 1),
        padding=((0, 0), (0, 0)),
        dimension_numbers=("NCHW", "OIHW", "NCHW"),
    )


if __name__ == "__main__":
    # SeparableConv2d(4, 8, kernel_size=3, stride=1, padding=1, dilation=1, bias=False)
    Cin, Cout, K, stride, padding, dilation = 4, 8, 3, 1, 1, 1
    H = W = 16

    key = jax.random.PRNGKey(0)
    kx, kdw, kpw, kx2 = jax.random.split(key, 4)
    w_dw = 0.1 * jax.random.normal(kdw, (Cin, 1, K, K), dtype=jnp.float32)
    w_pw = 0.1 * jax.random.normal(kpw, (Cout, Cin, 1, 1), dtype=jnp.float32)

    # Main case: B=2 (one packed batch pair).
    x = jax.random.normal(kx, (2, Cin, H, W), dtype=jnp.float32)
    out = separable_conv2d(x, w_dw, w_pw, stride=stride, padding=padding,
                           dilation=dilation)
    out = jax.block_until_ready(out)
    ref = _reference(x, w_dw, w_pw, stride=stride, padding=padding,
                     dilation=dilation)
    assert out.shape == (2, Cout, H, W), out.shape
    assert jnp.allclose(out, ref, atol=1e-4, rtol=1e-4), (
        float(jnp.max(jnp.abs(out - ref))))

    # Odd batch: exercises the zero-padded batch-pair packing path.
    x3 = jax.random.normal(kx2, (3, Cin, H, W), dtype=jnp.float32)
    out3 = separable_conv2d(x3, w_dw, w_pw, stride=stride, padding=padding,
                            dilation=dilation)
    out3 = jax.block_until_ready(out3)
    ref3 = _reference(x3, w_dw, w_pw, stride=stride, padding=padding,
                      dilation=dilation)
    assert out3.shape == (3, Cout, H, W), out3.shape
    assert jnp.allclose(out3, ref3, atol=1e-4, rtol=1e-4), (
        float(jnp.max(jnp.abs(out3 - ref3))))

    print("KERNEL_OK")
</pallas_src>

<mosaic_0001>
module attributes {stable_mosaic.version = 11 : i64} {
  func.func @kernel(%arg0: i32, %arg1: memref<1x8x512xf32, #tpu.memory_space<vmem>>, %arg2: memref<8x9xf32, #tpu.memory_space<vmem>>, %arg3: memref<8x4xf32, #tpu.memory_space<vmem>>, %arg4: memref<1x16x384xf32, #tpu.memory_space<vmem>>) attributes {dimension_semantics = [#tpu.dimension_semantics<parallel>], iteration_bounds = array<i64: 1>, scalar_prefetch = 0 : i64, scratch_operands = 0 : i64, tpu.core_type = #tpu.core_type<tc>, window_params = [{transform_indices = @transform_0, window_bounds = array<i64: 1, 8, 512>}, {pipeline_mode = #tpu.pipeline_mode<synchronous>, transform_indices = @transform_1, window_bounds = array<i64: 8, 9>}, {pipeline_mode = #tpu.pipeline_mode<synchronous>, transform_indices = @transform_2, window_bounds = array<i64: 8, 4>}, {transform_indices = @transform_3, window_bounds = array<i64: 1, 16, 384>}]} {
    %c0 = arith.constant 0 : index
    %c0_0 = arith.constant 0 : index
    %0 = vector.load %arg2[%c0, %c0_0] : memref<8x9xf32, #tpu.memory_space<vmem>>, vector<8x9xf32>
    %c0_1 = arith.constant 0 : index
    %c0_2 = arith.constant 0 : index
    %1 = vector.load %arg3[%c0_1, %c0_2] : memref<8x4xf32, #tpu.memory_space<vmem>>, vector<8x4xf32>
    %2 = vector.extract_strided_slice %0 {offsets = [0, 0], sizes = [8, 1], strides = [1, 1]} : vector<8x9xf32> to vector<8x1xf32>
    %3 = vector.extract_strided_slice %0 {offsets = [0, 1], sizes = [8, 1], strides = [1, 1]} : vector<8x9xf32> to vector<8x1xf32>
    %4 = vector.extract_strided_slice %0 {offsets = [0, 2], sizes = [8, 1], strides = [1, 1]} : vector<8x9xf32> to vector<8x1xf32>
    %5 = vector.extract_strided_slice %0 {offsets = [0, 3], sizes = [8, 1], strides = [1, 1]} : vector<8x9xf32> to vector<8x1xf32>
    %6 = vector.extract_strided_slice %0 {offsets = [0, 4], sizes = [8, 1], strides = [1, 1]} : vector<8x9xf32> to vector<8x1xf32>
    %7 = vector.extract_strided_slice %0 {offsets = [0, 5], sizes = [8, 1], strides = [1, 1]} : vector<8x9xf32> to vector<8x1xf32>
    %8 = vector.extract_strided_slice %0 {offsets = [0, 6], sizes = [8, 1], strides = [1, 1]} : vector<8x9xf32> to vector<8x1xf32>
    %9 = vector.extract_strided_slice %0 {offsets = [0, 7], sizes = [8, 1], strides = [1, 1]} : vector<8x9xf32> to vector<8x1xf32>
    %10 = vector.extract_strided_slice %0 {offsets = [0, 8], sizes = [8, 1], strides = [1, 1]} : vector<8x9xf32> to vector<8x1xf32>
    %11 = vector.extract_strided_slice %1 {offsets = [0, 0], sizes = [8, 1], strides = [1, 1]} : vector<8x4xf32> to vector<8x1xf32>
    %12 = vector.extract_strided_slice %1 {offsets = [0, 1], sizes = [8, 1], strides = [1, 1]} : vector<8x4xf32> to vector<8x1xf32>
    %13 = vector.extract_strided_slice %1 {offsets = [0, 2], sizes = [8, 1], strides = [1, 1]} : vector<8x4xf32> to vector<8x1xf32>
    %14 = vector.extract_strided_slice %1 {offsets = [0, 3], sizes = [8, 1], strides = [1, 1]} : vector<8x4xf32> to vector<8x1xf32>
    %c0_3 = arith.constant 0 : index
    %c0_4 = arith.constant 0 : index
    %c0_5 = arith.constant 0 : index
    %15 = vector.load %arg1[%c0_3, %c0_4, %c0_5] : memref<1x8x512xf32, #tpu.memory_space<vmem>>, vector<1x8x384xf32>
    %16 = vector.shape_cast %15 : vector<1x8x384xf32> to vector<8x384xf32>
    %17 = vector.broadcast %2 : vector<8x1xf32> to vector<8x384xf32>
    %18 = arith.mulf %16, %17 : vector<8x384xf32>
    %c0_6 = arith.constant 0 : index
    %c0_7 = arith.constant 0 : index
    %c1 = arith.constant 1 : index
    %19 = vector.load %arg1[%c0_6, %c0_7, %c1] : memref<1x8x512xf32, #tpu.memory_space<vmem>>, vector<1x8x384xf32>
    %20 = vector.shape_cast %19 : vector<1x8x384xf32> to vector<8x384xf32>
    %21 = vector.broadcast %3 : vector<8x1xf32> to vector<8x384xf32>
    %22 = arith.mulf %20, %21 : vector<8x384xf32>
    %23 = arith.addf %18, %22 : vector<8x384xf32>
    %c0_8 = arith.constant 0 : index
    %c0_9 = arith.constant 0 : index
    %c2 = arith.constant 2 : index
    %24 = vector.load %arg1[%c0_8, %c0_9, %c2] : memref<1x8x512xf32, #tpu.memory_space<vmem>>, vector<1x8x384xf32>
    %25 = vector.shape_cast %24 : vector<1x8x384xf32> to vector<8x384xf32>
    %26 = vector.broadcast %4 : vector<8x1xf32> to vector<8x384xf32>
    %27 = arith.mulf %25, %26 : vector<8x384xf32>
    %28 = arith.addf %23, %27 : vector<8x384xf32>
    %c0_10 = arith.constant 0 : index
    %c0_11 = arith.constant 0 : index
    %c18 = arith.constant 18 : index
    %29 = vector.load %arg1[%c0_10, %c0_11, %c18] : memref<1x8x512xf32, #tpu.memory_space<vmem>>, vector<1x8x384xf32>
    %30 = vector.shape_cast %29 : vector<1x8x384xf32> to vector<8x384xf32>
    %31 = vector.broadcast %5 : vector<8x1xf32> to vector<8x384xf32>
    %32 = arith.mulf %30, %31 : vector<8x384xf32>
    %33 = arith.addf %28, %32 : vector<8x384xf32>
    %c0_12 = arith.constant 0 : index
    %c0_13 = arith.constant 0 : index
    %c19 = arith.constant 19 : index
    %34 = vector.load %arg1[%c0_12, %c0_13, %c19] : memref<1x8x512xf32, #tpu.memory_space<vmem>>, vector<1x8x384xf32>
    %35 = vector.shape_cast %34 : vector<1x8x384xf32> to vector<8x384xf32>
    %36 = vector.broadcast %6 : vector<8x1xf32> to vector<8x384xf32>
    %37 = arith.mulf %35, %36 : vector<8x384xf32>
    %38 = arith.addf %33, %37 : vector<8x384xf32>
    %c0_14 = arith.constant 0 : index
    %c0_15 = arith.constant 0 : index
    %c20 = arith.constant 20 : index
    %39 = vector.load %arg1[%c0_14, %c0_15, %c20] : memref<1x8x512xf32, #tpu.memory_space<vmem>>, vector<1x8x384xf32>
    %40 = vector.shape_cast %39 : vector<1x8x384xf32> to vector<8x384xf32>
    %41 = vector.broadcast %7 : vector<8x1xf32> to vector<8x384xf32>
    %42 = arith.mulf %40, %41 : vector<8x384xf32>
    %43 = arith.addf %38, %42 : vector<8x384xf32>
    %c0_16 = arith.constant 0 : index
    %c0_17 = arith.constant 0 : index
    %c36 = arith.constant 36 : index
    %44 = vector.load %arg1[%c0_16, %c0_17, %c36] : memref<1x8x512xf32, #tpu.memory_space<vmem>>, vector<1x8x384xf32>
    %45 = vector.shape_cast %44 : vector<1x8x384xf32> to vector<8x384xf32>
    %46 = vector.broadcast %8 : vector<8x1xf32> to vector<8x384xf32>
    %47 = arith.mulf %45, %46 : vector<8x384xf32>
    %48 = arith.addf %43, %47 : vector<8x384xf32>
    %c0_18 = arith.constant 0 : index
    %c0_19 = arith.constant 0 : index
    %c37 = arith.constant 37 : index
    %49 = vector.load %arg1[%c0_18, %c0_19, %c37] : memref<1x8x512xf32, #tpu.memory_space<vmem>>, vector<1x8x384xf32>
    %50 = vector.shape_cast %49 : vector<1x8x384xf32> to vector<8x384xf32>
    %51 = vector.broadcast %9 : vector<8x1xf32> to vector<8x384xf32>
    %52 = arith.mulf %50, %51 : vector<8x384xf32>
    %53 = arith.addf %48, %52 : vector<8x384xf32>
    %c0_20 = arith.constant 0 : index
    %c0_21 = arith.constant 0 : index
    %c38 = arith.constant 38 : index
    %54 = vector.load %arg1[%c0_20, %c0_21, %c38] : memref<1x8x512xf32, #tpu.memory_space<vmem>>, vector<1x8x384xf32>
    %55 = vector.shape_cast %54 : vector<1x8x384xf32> to vector<8x384xf32>
    %56 = vector.broadcast %10 : vector<8x1xf32> to vector<8x384xf32>
    %57 = arith.mulf %55, %56 : vector<8x384xf32>
    %58 = arith.addf %53, %57 : vector<8x384xf32>
    %59 = vector.extract_strided_slice %58 {offsets = [0, 0], sizes = [1, 384], strides = [1, 1]} : vector<8x384xf32> to vector<1x384xf32>
    %60 = vector.broadcast %11 : vector<8x1xf32> to vector<8x384xf32>
    %61 = vector.broadcast %59 : vector<1x384xf32> to vector<8x384xf32>
    %62 = arith.mulf %60, %61 : vector<8x384xf32>
    %63 = vector.extract_strided_slice %58 {offsets = [1, 0], sizes = [1, 384], strides = [1, 1]} : vector<8x384xf32> to vector<1x384xf32>
    %64 = vector.broadcast %12 : vector<8x1xf32> to vector<8x384xf32>
    %65 = vector.broadcast %63 : vector<1x384xf32> to vector<8x384xf32>
    %66 = arith.mulf %64, %65 : vector<8x384xf32>
    %67 = arith.addf %62, %66 : vector<8x384xf32>
    %68 = vector.extract_strided_slice %58 {offsets = [2, 0], sizes = [1, 384], strides = [1, 1]} : vector<8x384xf32> to vector<1x384xf32>
    %69 = vector.broadcast %13 : vector<8x1xf32> to vector<8x384xf32>
    %70 = vector.broadcast %68 : vector<1x384xf32> to vector<8x384xf32>
    %71 = arith.mulf %69, %70 : vector<8x384xf32>
    %72 = arith.addf %67, %71 : vector<8x384xf32>
    %73 = vector.extract_strided_slice %58 {offsets = [3, 0], sizes = [1, 384], strides = [1, 1]} : vector<8x384xf32> to vector<1x384xf32>
    %74 = vector.broadcast %14 : vector<8x1xf32> to vector<8x384xf32>
    %75 = vector.broadcast %73 : vector<1x384xf32> to vector<8x384xf32>
    %76 = arith.mulf %74, %75 : vector<8x384xf32>
    %77 = arith.addf %72, %76 : vector<8x384xf32>
    %c0_22 = arith.constant 0 : index
    %c0_23 = arith.constant 0 : index
    %c0_24 = arith.constant 0 : index
    %78 = vector.load %arg4[%c0_22, %c0_23, %c0_24] : memref<1x16x384xf32, #tpu.memory_space<vmem>>, vector<1x8x384xf32>
    %79 = vector.shape_cast %78 : vector<1x8x384xf32> to vector<8x384xf32>
    %80 = vector.shape_cast %77 : vector<8x384xf32> to vector<1x8x384xf32>
    tpu.vector_store %arg4[%c0_22, %c0_23, %c0_24], %80 {strides = array<i32>} : memref<1x16x384xf32, #tpu.memory_space<vmem>>, vector<1x8x384xf32>,
    %81 = vector.extract_strided_slice %58 {offsets = [4, 0], sizes = [1, 384], strides = [1, 1]} : vector<8x384xf32> to vector<1x384xf32>
    %82 = vector.broadcast %11 : vector<8x1xf32> to vector<8x384xf32>
    %83 = vector.broadcast %81 : vector<1x384xf32> to vector<8x384xf32>
    %84 = arith.mulf %82, %83 : vector<8x384xf32>
    %85 = vector.extract_strided_slice %58 {offsets = [5, 0], sizes = [1, 384], strides = [1, 1]} : vector<8x384xf32> to vector<1x384xf32>
    %86 = vector.broadcast %12 : vector<8x1xf32> to vector<8x384xf32>
    %87 = vector.broadcast %85 : vector<1x384xf32> to vector<8x384xf32>
    %88 = arith.mulf %86, %87 : vector<8x384xf32>
    %89 = arith.addf %84, %88 : vector<8x384xf32>
    %90 = vector.extract_strided_slice %58 {offsets = [6, 0], sizes = [1, 384], strides = [1, 1]} : vector<8x384xf32> to vector<1x384xf32>
    %91 = vector.broadcast %13 : vector<8x1xf32> to vector<8x384xf32>
    %92 = vector.broadcast %90 : vector<1x384xf32> to vector<8x384xf32>
    %93 = arith.mulf %91, %92 : vector<8x384xf32>
    %94 = arith.addf %89, %93 : vector<8x384xf32>
    %95 = vector.extract_strided_slice %58 {offsets = [7, 0], sizes = [1, 384], strides = [1, 1]} : vector<8x384xf32> to vector<1x384xf32>
    %96 = vector.broadcast %14 : vector<8x1xf32> to vector<8x384xf32>
    %97 = vector.broadcast %95 : vector<1x384xf32> to vector<8x384xf32>
    %98 = arith.mulf %96, %97 : vector<8x384xf32>
    %99 = arith.addf %94, %98 : vector<8x384xf32>
    %c0_25 = arith.constant 0 : index
    %c8 = arith.constant 8 : index
    %c0_26 = arith.constant 0 : index
    %100 = vector.load %arg4[%c0_25, %c8, %c0_26] : memref<1x16x384xf32, #tpu.memory_space<vmem>>, vector<1x8x384xf32>
    %101 = vector.shape_cast %100 : vector<1x8x384xf32> to vector<8x384xf32>
    %102 = vector.shape_cast %99 : vector<8x384xf32> to vector<1x8x384xf32>
    tpu.vector_store %arg4[%c0_25, %c8, %c0_26], %102 {strides = array<i32>} : memref<1x16x384xf32, #tpu.memory_space<vmem>>, vector<1x8x384xf32>,
    return
  }
  func.func @transform_0(%arg0: i32) -> (i32, i32, i32) {
    %c0_i32 = arith.constant 0 : i32
    %c0_i32_0 = arith.constant 0 : i32
    %c0_i32_1 = arith.constant 0 : i32
    return %arg0, %c0_i32, %c0_i32_0 : i32, i32, i32
  }
  func.func @transform_1(%arg0: i32) -> (i32, i32) {
    %c0_i32 = arith.constant 0 : i32
    %c0_i32_0 = arith.constant 0 : i32
    %c0_i32_1 = arith.constant 0 : i32
    return %c0_i32, %c0_i32_0 : i32, i32
  }
  func.func @transform_2(%arg0: i32) -> (i32, i32) {
    %c0_i32 = arith.constant 0 : i32
    %c0_i32_0 = arith.constant 0 : i32
    %c0_i32_1 = arith.constant 0 : i32
    return %c0_i32, %c0_i32_0 : i32, i32
  }
  func.func @transform_3(%arg0: i32) -> (i32, i32, i32) {
    %c0_i32 = arith.constant 0 : i32
    %c0_i32_0 = arith.constant 0 : i32
    %c0_i32_1 = arith.constant 0 : i32
    return %arg0, %c0_i32, %c0_i32_0 : i32, i32, i32
  }
}

</mosaic_0001>

<bundles_post_ra>
// kernel: tpu_custom_call.1
= control target key start
LH: loop header
LB: loop body
LE: loop exit
PB: predicated region body
PF: predicated region fallthrough
CT: control target
= control target key end

     0   :  { %8 = vsyncpa [#allocation3], 0  ;;  %s633_s0 = inlined_call_operand.hbm [shape: f32[1,8,512], index: 0, kind: input, shape index: {}]   ;;  %s634_s1 = inlined_call_operand.vmem [shape: f32[8,9], index: 1, kind: input, shape index: {}]   ;;  %s635_s2 = inlined_call_operand.vmem [shape: f32[8,4], index: 2, kind: input, shape index: {}]   ;;  %s636_s3 = inlined_call_operand.hbm [shape: f32[1,16,384], index: 3, kind: output, shape index: {}]  }
   0x1   :  { %9 = vsyncpa [#allocation4], 0  ;;  %s15_s14 = sshll.u32 %s633_s0, 4  ;;  %s480_s15 = smov [#allocation2]   ;;  %s16_s14 = int_to_ptr.hbm [resolvable:$true] %s15_s14 }
   0x2   :  { %s17_s16 = sshll.u32 %s480_s15, 4  ;;  %s18_s16 = int_to_ptr.vmem [resolvable:$true] %s17_s16 }
   0x3   :  { %20 = dma.hbm_to_vmem [thread:$0]  %s16_s14, 512, %s18_s16, [#allocation3]  }
   0x4   :  { %476 = dma.done.wait [#allocation3], 512  }
   0x5   :  { %477 = vsyncadd [#allocation3], 4294966784  ;;  %v481_v0 = vmov 2   ;;  %v482_v1 = vmov 1   ;;  %v483_v2 = vmov 5   ;;  %v29_v3 = vld [vmem:[%s634_s1] sm:$0xff] }
   0x6   :  { %416 = vset.pattern.permute.xlu1 %v481_v0  ;;  %415 = vset.pattern.permute.xlu0 %v482_v1  ;;  %v484_v4 = vmov 3   ;;  %v485_v5 = vmov 7   ;;  %v486_v6 = vmov 8   ;;  %v487_v7 = vmov 4   ;;  %v528_v10 = vld [vmem:[#allocation2 + $0x8] sm:$0xff]  ;;  %v530_v11 = vld [vmem:[#allocation2 + $0x10] sm:$0xff] }
   0x7   :  { %419 = vset.pattern.permute.xlu2 %v483_v2  ;;  %77 = vperm.xlu1 %416, %v29_v3   ;;  %v488_v8 = vmov 6   ;;  %v489_v9 = vmov 0   ;;  %v532_v12 = vld [vmem:[#allocation2] sm:$0xff]  ;;  %s490_s0 = smov 126   ;;  %s491_s1 = smov 127   ;;  %v537_v19 = vld [vmem:[#allocation2 + $0x18] sm:$0xff] }
   0x8   :  { %47 = vperm.xlu0 %415, %v29_v3   ;;  %167 = vperm.xlu2 %419, %v29_v3   ;;  %s492_s19 = smov 108   ;;  %s493_s20 = smov 110   ;;  %v30_v44 = vld [vmem:[%s635_s2] sm:$0xff]  ;;  %vm66_vm0 = vcmask 1039360   ;;  %vm96_vm1 = vcmask 1031168   ;;  %vm126_vm2 = vcmask 900096  }
   0x9   :  { %s494_s21 = smov 92   ;;  %s495_s22 = smov 109   ;;  %vm156_vm3 = vcmask 891904   ;;  %vm186_vm4 = vcmask 883712   ;;  %vm216_vm5 = vcmask 752640   ;;  %vm246_vm6 = vcmask 744448  }
   0xa   :  { %s496_s23 = smov 91   ;;  %s497_s24 = smov 90   ;;  %vm276_vm7 = vcmask 736256  }
   0xb   :  { %s498_s2 = smov [#allocation5]   ;;  %s381_s30 = sshll.u32 %s636_s3, 4  ;;  %s382_s30 = int_to_ptr.hbm [resolvable:$true] %s381_s30 }
   0xc   :  { %s379_s27 = sshll.u32 %s498_s2, 4  ;;  %s499_s4 = smov 384   ;;  %s380_s27 = int_to_ptr.vmem [resolvable:$true] %s379_s27 }
   0xd   :  { %s500_s5 = smov 24  }
   0xf   :  { %422 = vset.pattern.permute.xlu1 %v485_v5 }
  0x10   :  { %417 = vset.pattern.permute.xlu0 %v484_v4  ;;  %227 = vperm.xlu1 %422, %v29_v3  }
  0x11   :  { %107 = vperm.xlu0 %417, %v29_v3   ;;  %423 = vset.pattern.permute.xlu2 %v486_v6 }
  0x12   :  { %257 = vperm.xlu2 %423, %v29_v3  }
  0x18   :  { %424 = vset.pattern.permute.xlu1 %v482_v1 }
  0x19   :  { %418 = vset.pattern.permute.xlu0 %v487_v7 }
  0x1a   :  { %137 = vperm.xlu0 %418, %v29_v3   ;;  %425 = vset.pattern.permute.xlu2 %v481_v0 }
  0x22   :  { %420 = vset.pattern.permute.xlu0 %v488_v8 }
  0x23   :  { %197 = vperm.xlu0 %420, %v29_v3  }
  0x2b   :  { %421 = vset.pattern.permute.xlu0 %v489_v9 }
  0x2c   :  { %36 = vperm.xlu0 %421, %v29_v3  }
  0x62   :  { %v168_v18 = vpop.permute.xlu2 %167 }
  0x63   :  { %v171_v20 = vmul.f32 %v168_v18, %v528_v10  ;;  %v170_v42 = vmul.f32 %v168_v18, %v532_v12  ;;  %v173_v45 = vmul.f32 %v168_v18, %v537_v19  ;;  %v172_v46 = vmul.f32 %v168_v18, %v530_v11 }
  0x6c   :  { %v258_v38 = vpop.permute.xlu2 %257 }
  0x6d   :  { %v261_v41 = vmul.f32 %v258_v38, %v528_v10  ;;  %v260_v51 = vmul.f32 %v258_v38, %v532_v12  ;;  %v263_v54 = vmul.f32 %v258_v38, %v537_v19  ;;  %v262_v55 = vmul.f32 %v258_v38, %v530_v11 }
  0x79   :  { %v78_v13 = vpop.permute.xlu1 %77 }
  0x7a   :  { %v48_v14 = vpop.permute.xlu0 %47  ;;  %v81_v15 = vmul.f32 %v78_v13, %v528_v10  ;;  %v80_v24 = vmul.f32 %v78_v13, %v532_v12  ;;  %v82_v25 = vmul.f32 %v78_v13, %v530_v11  ;;  %v83_v28 = vmul.f32 %v78_v13, %v537_v19 }
  0x7b   :  { %v52_v16 = vmul.f32 %v48_v14, %v530_v11  ;;  %v50_v17 = vmul.f32 %v48_v14, %v532_v12  ;;  %v53_v21 = vmul.f32 %v48_v14, %v537_v19  ;;  %v51_v23 = vmul.f32 %v48_v14, %v528_v10 }
  0x7c   :  { %90 = vrot.lane.b32.xlu0 %v81_v15, %s490_s0 }
  0x7d   :  { %62 = vrot.lane.b32.xlu2 %v52_v16, %s491_s1  ;;  %58 = vrot.lane.b32.xlu1 %v50_v17, %s491_s1 }
  0x82   :  { %v228_v34 = vpop.permute.xlu1 %227 }
  0x83   :  { %v108_v22 = vpop.permute.xlu0 %107  ;;  %v232_v37 = vmul.f32 %v228_v34, %v530_v11  ;;  %v231_v49 = vmul.f32 %v228_v34, %v528_v10  ;;  %v230_v50 = vmul.f32 %v228_v34, %v532_v12  ;;  %v233_v52 = vmul.f32 %v228_v34, %v537_v19 }
  0x84   :  { %180 = vrot.lane.b32.xlu0 %v171_v20, %s492_s19  ;;  %v110_v27 = vmul.f32 %v108_v22, %v532_v12  ;;  %v111_v31 = vmul.f32 %v108_v22, %v528_v10  ;;  %v112_v32 = vmul.f32 %v108_v22, %v530_v11  ;;  %v113_v36 = vmul.f32 %v108_v22, %v537_v19 }
  0x85   :  { %64 = vrot.lane.b32.xlu2 %v53_v21, %s491_s1  ;;  %60 = vrot.lane.b32.xlu1 %v51_v23, %s491_s1 }
  0x8c   :  { %v138_v26 = vpop.permute.xlu0 %137 }
  0x8d   :  { %88 = vrot.lane.b32.xlu2 %v80_v24, %s490_s0  ;;  %92 = vrot.lane.b32.xlu1 %v82_v25, %s490_s0  ;;  %v140_v35 = vmul.f32 %v138_v26, %v532_v12  ;;  %v141_v39 = vmul.f32 %v138_v26, %v528_v10  ;;  %v142_v40 = vmul.f32 %v138_v26, %v530_v11 }
  0x8e   :  { %v143_v43 = vmul.f32 %v138_v26, %v537_v19 }
  0x95   :  { %94 = vrot.lane.b32.xlu2 %v83_v28, %s490_s0  ;;  %v198_v29 = vpop.permute.xlu0 %197  ;;  %118 = vrot.lane.b32.xlu1 %v110_v27, %s493_s20 }
  0x96   :  { %v200_v30 = vmul.f32 %v198_v29, %v532_v12  ;;  %v203_v33 = vmul.f32 %v198_v29, %v537_v19  ;;  %v202_v47 = vmul.f32 %v198_v29, %v530_v11  ;;  %v201_v48 = vmul.f32 %v198_v29, %v528_v10 }
  0x98   :  { %208 = vrot.lane.b32.xlu0 %v200_v30, %s494_s21 }
  0x9d   :  { %120 = vrot.lane.b32.xlu2 %v111_v31, %s493_s20  ;;  %122 = vrot.lane.b32.xlu1 %v112_v32, %s493_s20 }
  0x9e   :  { %v37_v59 = vpop.permute.xlu0 %36 }
  0x9f   :  { %v39_v62 = vmul.f32 %v532_v12, %v37_v59  ;;  %v40_v6 = vmul.f32 %v528_v10, %v37_v59  ;;  %v41_v7 = vmul.f32 %v530_v11, %v37_v59 }
  0xa0   :  { %214 = vrot.lane.b32.xlu0 %v203_v33, %s494_s21 }
  0xa5   :  { %124 = vrot.lane.b32.xlu2 %v113_v36, %s493_s20  ;;  %148 = vrot.lane.b32.xlu1 %v140_v35, %s495_s22 }
  0xa8   :  { %242 = vrot.lane.b32.xlu0 %v232_v37, %s496_s23 }
  0xad   :  { %150 = vrot.lane.b32.xlu2 %v141_v39, %s495_s22  ;;  %152 = vrot.lane.b32.xlu1 %v142_v40, %s495_s22 }
  0xb0   :  { %270 = vrot.lane.b32.xlu0 %v261_v41, %s497_s24 }
  0xb5   :  { %178 = vrot.lane.b32.xlu2 %v170_v42, %s492_s19  ;;  %154 = vrot.lane.b32.xlu1 %v143_v43, %s495_s22 }
  0xb8   :  { %288 = vperm.xlu0 %421, %v30_v44  }
  0xbd   :  { %184 = vrot.lane.b32.xlu2 %v173_v45, %s492_s19  ;;  %182 = vrot.lane.b32.xlu1 %v172_v46, %s492_s19 }
  0xc0   :  { %427 = vset.pattern.permute.xlu0 %v484_v4 }
  0xc5   :  { %212 = vrot.lane.b32.xlu2 %v202_v47, %s494_s21  ;;  %210 = vrot.lane.b32.xlu1 %v201_v48, %s494_s21 }
  0xcd   :  { %240 = vrot.lane.b32.xlu2 %v231_v49, %s496_s23  ;;  %238 = vrot.lane.b32.xlu1 %v230_v50, %s496_s23 }
  0xd5   :  { %268 = vrot.lane.b32.xlu2 %v260_v51, %s497_s24  ;;  %244 = vrot.lane.b32.xlu1 %v233_v52, %s496_s23 }
  0xd7   :  { %v63_v53 = vpop.permute.xlu2 %62 }
  0xdd   :  { %274 = vrot.lane.b32.xlu2 %v263_v54, %s497_s24  ;;  %272 = vrot.lane.b32.xlu1 %v262_v55, %s497_s24 }
  0xdf   :  { %v65_v56 = vpop.permute.xlu2 %64 }
  0xe0   :  { %v69_v57 = vsel %vm66_vm0, %v63_v53, %v65_v56 }
  0xe1   :  { %v75_v9 = vadd.f32 %v69_v57, %v41_v7 }
  0xe5   :  { %311 = vperm.xlu2 %425, %v30_v44   ;;  %298 = vperm.xlu1 %424, %v30_v44  }
  0xe7   :  { %v89_v58 = vpop.permute.xlu2 %88 }
  0xed   :  { %426 = vset.pattern.permute.xlu1 %v484_v4 }
  0xee   :  { %324 = vperm.xlu1 %426, %v30_v44   ;;  %v91_v63 = vpop.permute.xlu0 %90 }
  0xef   :  { %v59_v60 = vpop.permute.xlu1 %58  ;;  %v95_v61 = vpop.permute.xlu2 %94  ;;  %v97_v5 = vsel %vm96_vm1, %v89_v58, %v91_v63 }
  0xf6   :  { %v181_v25 = vpop.permute.xlu0 %180 }
  0xf7   :  { %v61_v0 = vpop.permute.xlu1 %60  ;;  %v121_v8 = vpop.permute.xlu2 %120 }
  0xf8   :  { %v67_v1 = vsel %vm66_vm0, %v59_v60, %v61_v0  ;;  %v68_v2 = vsel %vm66_vm0, %v61_v0, %v63_v53 }
  0xf9   :  { %v73_v3 = vadd.f32 %v67_v1, %v39_v62  ;;  %v74_v13 = vadd.f32 %v68_v2, %v40_v6 }
  0xfb   :  { %v103_v4 = vadd.f32 %v97_v5, %v73_v3 }
  0xff   :  { %v93_v14 = vpop.permute.xlu1 %92  ;;  %v125_v18 = vpop.permute.xlu2 %124 }
 0x100   :  { %v98_v15 = vsel %vm96_vm1, %v91_v63, %v93_v14  ;;  %v99_v12 = vsel %vm96_vm1, %v93_v14, %v95_v61 }
 0x101   :  { %v104_v16 = vadd.f32 %v98_v15, %v74_v13  ;;  %v105_v17 = vadd.f32 %v99_v12, %v75_v9 }
 0x107   :  { %v119_v19 = vpop.permute.xlu1 %118  ;;  %v151_v23 = vpop.permute.xlu2 %150 }
 0x108   :  { %v127_v20 = vsel %vm126_vm2, %v119_v19, %v121_v8 }
 0x109   :  { %v133_v21 = vadd.f32 %v127_v20, %v103_v4 }
 0x10a   :  { %v209_v28 = vpop.permute.xlu0 %208 }
 0x10f   :  { %v123_v22 = vpop.permute.xlu1 %122  ;;  %v179_v24 = vpop.permute.xlu2 %178 }
 0x110   :  { %v128_v36 = vsel %vm126_vm2, %v121_v8, %v123_v22  ;;  %v129_v39 = vsel %vm126_vm2, %v123_v22, %v125_v18  ;;  %v187_v45 = vsel %vm186_vm4, %v179_v24, %v181_v25 }
 0x111   :  { %v134_v42 = vadd.f32 %v128_v36, %v104_v16  ;;  %v135_v44 = vadd.f32 %v129_v39, %v105_v17 }
 0x112   :  { %v215_v32 = vpop.permute.xlu0 %214 }
 0x117   :  { %v149_v10 = vpop.permute.xlu1 %148  ;;  %v185_v26 = vpop.permute.xlu2 %184 }
 0x118   :  { %v157_v35 = vsel %vm156_vm3, %v149_v10, %v151_v23 }
 0x119   :  { %v163_v40 = vadd.f32 %v157_v35, %v133_v21 }
 0x11a   :  { %v243_v37 = vpop.permute.xlu0 %242 }
 0x11b   :  { %v193_v50 = vadd.f32 %v187_v45, %v163_v40 }
 0x11f   :  { %v153_v11 = vpop.permute.xlu1 %152  ;;  %v213_v29 = vpop.permute.xlu2 %212 }
 0x120   :  { %v158_v41 = vsel %vm156_vm3, %v151_v23, %v153_v11  ;;  %v219_v62 = vsel %vm216_vm5, %v213_v29, %v215_v32 }
 0x121   :  { %v164_v48 = vadd.f32 %v158_v41, %v134_v42 }
 0x122   :  { %v271_v60 = vpop.permute.xlu0 %270 }
 0x127   :  { %v155_v27 = vpop.permute.xlu1 %154  ;;  %v241_v33 = vpop.permute.xlu2 %240 }
 0x128   :  { %v159_v43 = vsel %vm156_vm3, %v153_v11, %v155_v27  ;;  %v248_v0 = vsel %vm246_vm6, %v241_v33, %v243_v37 }
 0x129   :  { %v165_v52 = vadd.f32 %v159_v43, %v135_v44 }
 0x12a   :  { %v289_v20 = vpop.permute.xlu0 %288 }
 0x12f   :  { %v183_v30 = vpop.permute.xlu1 %182  ;;  %v269_v38 = vpop.permute.xlu2 %268 }
 0x130   :  { %v188_v46 = vsel %vm186_vm4, %v181_v25, %v183_v30  ;;  %v189_v49 = vsel %vm186_vm4, %v183_v30, %v185_v26  ;;  %v277_v1 = vsel %vm276_vm7, %v269_v38, %v271_v60 }
 0x131   :  { %v194_v55 = vadd.f32 %v188_v46, %v164_v48  ;;  %v195_v57 = vadd.f32 %v189_v49, %v165_v52 }
 0x133   :  { %v225_v2 = vadd.f32 %v219_v62, %v195_v57 }
 0x137   :  { %v211_v31 = vpop.permute.xlu1 %210  ;;  %v275_v61 = vpop.permute.xlu2 %274 }
 0x138   :  { %v217_v47 = vsel %vm216_vm5, %v209_v28, %v211_v31  ;;  %v218_v53 = vsel %vm216_vm5, %v211_v31, %v213_v29 }
 0x139   :  { %v223_v56 = vadd.f32 %v217_v47, %v193_v50  ;;  %v224_v58 = vadd.f32 %v218_v53, %v194_v55 }
 0x13b   :  { %v254_v6 = vadd.f32 %v248_v0, %v224_v58 }
 0x13f   :  { %v239_v34 = vpop.permute.xlu1 %238  ;;  %v312_v12 = vpop.permute.xlu2 %311 }
 0x140   :  { %v247_v54 = vsel %vm246_vm6, %v239_v34, %v241_v33 }
 0x141   :  { %v253_v59 = vadd.f32 %v247_v54, %v223_v56 }
 0x143   :  { %v600_v3 = vadd.f32 %v277_v1, %v253_v59 }
 0x145   :  { %v314_v14 = vperm.slane %v600_v3, 2  ;;  %v291_v15 = vperm.slane %v600_v3, 0  ;;  %v354_v16 = vperm.slane %v600_v3, 6  ;;  %v301_v18 = vperm.slane %v600_v3, 1 }
 0x146   :  { %v339_v19 = vperm.slane %v600_v3, 4  ;;  %v345_v10 = vperm.slane %v600_v3, 5  ;;  %v327_v26 = vperm.slane %v600_v3, 3  ;;  %v363_v27 = vperm.slane %v600_v3, 7 }
 0x147   :  { %v245_v51 = vpop.permute.xlu1 %244  ;;  %v317_v24 = vmul.f32 %v314_v14, %v312_v12  ;;  %v294_v25 = vmul.f32 %v291_v15, %v289_v20  ;;  %v357_v40 = vmul.f32 %v354_v16, %v312_v12 }
 0x148   :  { %v249_v63 = vsel %vm246_vm6, %v243_v37, %v245_v51  ;;  %v342_v47 = vmul.f32 %v339_v19, %v289_v20 }
 0x149   :  { %v255_v7 = vadd.f32 %v249_v63, %v225_v2 }
 0x14f   :  { %v273_v5 = vpop.permute.xlu1 %272 }
 0x150   :  { %v278_v4 = vsel %vm276_vm7, %v271_v60, %v273_v5  ;;  %v279_v8 = vsel %vm276_vm7, %v273_v5, %v275_v61 }
 0x151   :  { %v602_v9 = vadd.f32 %v278_v4, %v254_v6  ;;  %v604_v13 = vadd.f32 %v279_v8, %v255_v7 }
 0x153   :  { %v292_v17 = vperm.slane %v602_v9, 0  ;;  %v293_v21 = vperm.slane %v604_v13, 0  ;;  %v302_v22 = vperm.slane %v602_v9, 1  ;;  %v303_v23 = vperm.slane %v604_v13, 1 }
 0x154   :  { %v340_v31 = vperm.slane %v602_v9, 4  ;;  %v341_v33 = vperm.slane %v604_v13, 4  ;;  %v346_v34 = vperm.slane %v602_v9, 5  ;;  %v347_v35 = vperm.slane %v604_v13, 5 }
 0x155   :  { %v295_v32 = vmul.f32 %v292_v17, %v289_v20  ;;  %v296_v36 = vmul.f32 %v293_v21, %v289_v20  ;;  %v315_v38 = vperm.slane %v602_v9, 2  ;;  %v316_v39 = vperm.slane %v604_v13, 2 }
 0x156   :  { %v355_v43 = vperm.slane %v602_v9, 6  ;;  %v343_v48 = vmul.f32 %v340_v31, %v289_v20  ;;  %v344_v49 = vmul.f32 %v341_v33, %v289_v20  ;;  %v328_v50 = vperm.slane %v602_v9, 3 }
 0x157   :  { %v299_v11 = vpop.permute.xlu1 %298  ;;  %v329_v51 = vperm.slane %v604_v13, 3  ;;  %v318_v53 = vmul.f32 %v315_v38, %v312_v12  ;;  %v319_v54 = vmul.f32 %v316_v39, %v312_v12  ;;  %v356_v55 = vperm.slane %v604_v13, 6 }
 0x158   :  { %v304_v28 = vmul.f32 %v301_v18, %v299_v11  ;;  %v305_v29 = vmul.f32 %v302_v22, %v299_v11  ;;  %v306_v30 = vmul.f32 %v303_v23, %v299_v11  ;;  %v348_v37 = vmul.f32 %v345_v10, %v299_v11 }
 0x159   :  { %v349_v41 = vmul.f32 %v346_v34, %v299_v11  ;;  %v350_v42 = vmul.f32 %v347_v35, %v299_v11  ;;  %v358_v58 = vmul.f32 %v355_v43, %v312_v12  ;;  %v364_v59 = vperm.slane %v602_v9, 7 }
 0x15a   :  { %v307_v44 = vadd.f32 %v304_v28, %v294_v25  ;;  %v308_v45 = vadd.f32 %v305_v29, %v295_v32  ;;  %v309_v46 = vadd.f32 %v306_v30, %v296_v36  ;;  %v351_v52 = vadd.f32 %v348_v37, %v342_v47 }
 0x15b   :  { %v352_v56 = vadd.f32 %v349_v41, %v343_v48  ;;  %v353_v57 = vadd.f32 %v350_v42, %v344_v49  ;;  %v365_v0 = vperm.slane %v604_v13, 7  ;;  %v359_v6 = vmul.f32 %v356_v55, %v312_v12 }
 0x15c   :  { %v320_v61 = vadd.f32 %v317_v24, %v307_v44  ;;  %v321_v62 = vadd.f32 %v318_v53, %v308_v45  ;;  %v322_v63 = vadd.f32 %v319_v54, %v309_v46  ;;  %v360_v7 = vadd.f32 %v357_v40, %v351_v52 }
 0x15d   :  { %v361_v17 = vadd.f32 %v358_v58, %v352_v56  ;;  %v362_v18 = vadd.f32 %v359_v6, %v353_v57 }
 0x160   :  { %v325_v60 = vpop.permute.xlu1 %324 }
 0x161   :  { %v330_v1 = vmul.f32 %v327_v26, %v325_v60  ;;  %v331_v2 = vmul.f32 %v328_v50, %v325_v60  ;;  %v332_v3 = vmul.f32 %v329_v51, %v325_v60  ;;  %v366_v5 = vmul.f32 %v363_v27, %v325_v60 }
 0x162   :  { %v367_v4 = vmul.f32 %v364_v59, %v325_v60  ;;  %v368_v8 = vmul.f32 %v365_v0, %v325_v60 }
 0x163   :  { %v333_v14 = vadd.f32 %v330_v1, %v320_v61  ;;  %v334_v15 = vadd.f32 %v331_v2, %v321_v62  ;;  %v335_v16 = vadd.f32 %v332_v3, %v322_v63  ;;  %v369_v9 = vadd.f32 %v366_v5, %v360_v7 }
 0x164   :  { %v370_v13 = vadd.f32 %v367_v4, %v361_v17  ;;  %v371_v19 = vadd.f32 %v368_v8, %v362_v18 }
 0x165   :  { %336 = vst [vmem:[#allocation5] sm:$0xff] %v333_v14 }
 0x166   :  { %337 = vst [vmem:[#allocation5 + $0x8] sm:$0xff] %v334_v15 }
 0x167   :  { %338 = vst [vmem:[#allocation5 + $0x10] sm:$0xff] %v335_v16 }
 0x168   :  { %372 = vst [vmem:[#allocation5 + $0x18] sm:$0xff] %v369_v9 }
 0x169   :  { %373 = vst [vmem:[#allocation5 + $0x20] sm:$0xff] %v370_v13 }
 0x16a   :  { %374 = vst [vmem:[#allocation5 + $0x28] sm:$0xff] %v371_v19 }
 0x16b   :  { %387 = dma.vmem_to_hbm [thread:$0]  %s380_s27, 768, %s382_s30, [#allocation4], %s499_s4, %s499_s4, %s500_s5  }
 0x16c   :  { %478 = dma.done.wait [#allocation4], 768  }
 0x16d   :  { %479 = vsyncadd [#allocation4], 4294966528 }
 0x16e   :  { %392 = vsyncpa [#allocation3], 1 }
 0x16f   :  { %393 = vsyncpa [#allocation4], 1 }

</bundles_post_ra>
